<compile_context>
chip_gen: v5e
topology: v5e:2x2
jax: 0.10.0
libtpu: 0.0.40
codegen_flags: <defaults>
</compile_context>

<pallas_src>
import math
import functools

import numpy as np
import jax
import jax.numpy as jnp
from jax import lax
from jax.experimental import pallas as pl
from jax.experimental.pallas import tpu as pltpu


# ----------------------------------------------------------------------------
# Buffer construction (deterministic, mirrors nn.Module.__init__) -- plain JAX.
# ----------------------------------------------------------------------------
def make_positional_encoding(d_model: int, max_len: int = 1000,
                             dtype=jnp.float32) -> jnp.ndarray:
    position = jnp.arange(0, max_len, dtype=jnp.float32)[:, None]            # (L, 1)
    div_term = jnp.exp(jnp.arange(0, d_model, 2, dtype=jnp.float32)
                       * (-math.log(10000.0) / d_model))                     # (D/2,)
    ang = position * div_term                                                # (L, D/2)
    pe = jnp.zeros((max_len, d_model), dtype=jnp.float32)
    pe = pe.at[:, 0::2].set(jnp.sin(ang))
    pe = pe.at[:, 1::2].set(jnp.cos(ang))
    return pe[None].astype(dtype)                                            # (1, L, D)


# ----------------------------------------------------------------------------
# Pallas kernel: y = dropout(x + pe, p) over a lane-dense flat tile.
#   x_ref : (B, TF)   pe_ref : (1, TF)   o_ref : (B, TF)
# ----------------------------------------------------------------------------
# int32 bit patterns of the usual mixing constants (wraparound multiply is fine).
_GOLD = 0x9E3779B9 - (1 << 32)      # -1640531527
_MIX1 = 0x7FEB352D                  #  2146038573
_MIX2 = 0x846CA68B - (1 << 32)      # -2073450869


def _pe_dropout_kernel(seed_ref, x_ref, pe_ref, o_ref, *, p: float, total_cols: int):
    xv = x_ref[...]                                       # (B, TF)
    pev = pe_ref[...]                                     # (1, TF)  broadcasts over B
    y = xv.astype(jnp.float32) + pev.astype(jnp.float32)

    if p > 0.0:
        bt, tf = xv.shape
        # Per-element counter: global flat position of every element in (B, S*D).
        row = lax.broadcasted_iota(jnp.int32, (bt, tf), 0)
        col = lax.broadcasted_iota(jnp.int32, (bt, tf), 1)
        gcol = pl.program_id(0) * tf + col                # global flat column
        elem = row * jnp.int32(total_cols) + gcol

        # lowbias32-style integer mixer (all ops are plain i32: mul/xor/shrl).
        h = elem + seed_ref[0] * jnp.int32(_GOLD)
        h = h ^ lax.shift_right_logical(h, jnp.int32(16))
        h = h * jnp.int32(_MIX1)
        h = h ^ lax.shift_right_logical(h, jnp.int32(15))
        h = h * jnp.int32(_MIX2)
        h = h ^ lax.shift_right_logical(h, jnp.int32(16))

        # Integer threshold compare on the low 31 bits: P(drop) = thresh / 2^31.
        h31 = jnp.bitwise_and(h, jnp.int32(0x7FFFFFFF))
        thresh = jnp.int32(min(int(p * (1 << 31)), (1 << 31) - 1))
        keep = h31 >= thresh

        # Inverted dropout: kept values scaled by 1/(1-p), dropped are exact 0.
        y = jnp.where(keep, y * jnp.float32(1.0 / (1.0 - p)), jnp.zeros_like(y))

    o_ref[...] = y.astype(o_ref.dtype)


# ----------------------------------------------------------------------------
# Wrapper: flatten to (B, S*D), tile the flat axis, call pallas_call.
# ----------------------------------------------------------------------------
def positional_encoding_forward(x: jnp.ndarray,
                                pe: jnp.ndarray,
                                seed: int = 0,
                                p: float = 0.1,
                                training: bool = True) -> jnp.ndarray:
    """x: (B, S, D);  pe: (1, max_len, D).  Returns (B, S, D)."""
    B, S, D = x.shape
    assert pe.shape[0] == 1 and pe.shape[1] >= S and pe.shape[2] == D
    F = S * D

    x2 = x.reshape(B, F)
    pe2 = pe[0, :S, :].reshape(1, F)                      # glue: tiny slice/reshape
    p_eff = float(p) if training else 0.0

    # Pick a lane-dense tile width TF (multiple of 128, divides F) whose
    # double-buffered footprint (x tile + out tile: B rows each, pe tile: 1 row)
    # stays under ~8 MiB -> fits the default scoped VMEM on v5e/v6e/v7x.
    if F % 128 == 0:
        itemsize = jnp.dtype(x.dtype).itemsize
        per_col_bytes = (2 * B + 1) * itemsize * 2        # x2 + out (B rows) + pe (1), x2 buffers
        budget = 8 * 1024 * 1024
        tf = (budget // per_col_bytes) // 128 * 128
        tf = max(128, min(tf, F))
        while F % tf:
            tf -= 128
    else:
        tf = F                                            # fallback: one full-width block
    grid = (F // tf,)

    seed_arr = jnp.full((1,), seed, dtype=jnp.int32)
    kernel = functools.partial(_pe_dropout_kernel, p=p_eff, total_cols=F)

    y2 = pl.pallas_call(
        kernel,
        out_shape=jax.ShapeDtypeStruct((B, F), x.dtype),
        grid_spec=pltpu.PrefetchScalarGridSpec(
            num_scalar_prefetch=1,                        # seed lives in SMEM
            grid=grid,
            in_specs=[
                pl.BlockSpec((B, tf), lambda f, s: (0, f)),   # x tile (all batch rows)
                pl.BlockSpec((1, tf), lambda f, s: (0, f)),   # pe tile, read once per f
            ],
            out_specs=pl.BlockSpec((B, tf), lambda f, s: (0, f)),
        ),
        compiler_params=pltpu.CompilerParams(
            dimension_semantics=("parallel",),            # independent tiles -> megacore OK
        ),
    )(seed_arr, x2, pe2)

    return y2.reshape(B, S, D)


# ----------------------------------------------------------------------------
# Demo / self-check
# ----------------------------------------------------------------------------
if __name__ == "__main__":
    d_model, max_len = 32, 1000
    B, S = 2, 8
    dropout_p = 0.1

    key = jax.random.PRNGKey(0)
    x = jax.random.normal(key, (B, S, d_model), dtype=jnp.float32)
    pe = make_positional_encoding(d_model, max_len)
    ref = x + pe[:, :S, :]

    # Eval mode (dropout is identity): must equal x + pe[:, :S] exactly.
    y_eval = positional_encoding_forward(x, pe, seed=0, p=dropout_p, training=False)
    jax.block_until_ready(y_eval)
    np.testing.assert_allclose(np.asarray(y_eval), np.asarray(ref), rtol=1e-6, atol=1e-6)

    # Training mode (in-kernel integer-hash dropout).
    y_train = positional_encoding_forward(x, pe, seed=123, p=dropout_p, training=True)
    jax.block_until_ready(y_train)
    yt = np.asarray(y_train)
    assert yt.shape == (B, S, d_model) and np.all(np.isfinite(yt))
    scaled = np.asarray(ref) / (1.0 - dropout_p)
    # Kept entries are scaled by 1/(1-p); dropped entries are exactly zero.
    assert np.all((yt == 0.0) | np.isclose(yt, scaled, rtol=1e-5, atol=1e-5))

    print("KERNEL_OK")
</pallas_src>

<mosaic_0001>
module attributes {stable_mosaic.version = 11 : i64} {
  func.func @_pe_dropout_kernel(%arg0: i32, %arg1: memref<1xi32, #tpu.memory_space<smem>>, %arg2: memref<2x256xf32, #tpu.memory_space<vmem>>, %arg3: memref<1x256xf32, #tpu.memory_space<vmem>>, %arg4: memref<2x256xf32, #tpu.memory_space<vmem>>) attributes {dimension_semantics = [#tpu.dimension_semantics<parallel>], iteration_bounds = array<i64: 1>, scalar_prefetch = 1 : i64, scratch_operands = 0 : i64, tpu.core_type = #tpu.core_type<tc>, window_params = [{transform_indices = @transform_0, window_bounds = array<i64: 2, 256>}, {transform_indices = @transform_1, window_bounds = array<i64: 1, 256>}, {transform_indices = @transform_2, window_bounds = array<i64: 2, 256>}]} {
    %c0 = arith.constant 0 : index
    %c0_0 = arith.constant 0 : index
    %0 = vector.load %arg2[%c0, %c0_0] : memref<2x256xf32, #tpu.memory_space<vmem>>, vector<2x256xf32>
    %c0_1 = arith.constant 0 : index
    %c0_2 = arith.constant 0 : index
    %1 = vector.load %arg3[%c0_1, %c0_2] : memref<1x256xf32, #tpu.memory_space<vmem>>, vector<1x256xf32>
    %2 = vector.broadcast %1 : vector<1x256xf32> to vector<2x256xf32>
    %3 = arith.addf %0, %2 : vector<2x256xf32>
    %c0_3 = arith.constant 0 : index
    %c0_4 = arith.constant 0 : index
    %4 = vector.load %arg4[%c0_3, %c0_4] : memref<2x256xf32, #tpu.memory_space<vmem>>, vector<2x256xf32>
    tpu.vector_store %arg4[%c0_3, %c0_4], %3 {strides = array<i32>} : memref<2x256xf32, #tpu.memory_space<vmem>>, vector<2x256xf32>,
    return
  }
  func.func @transform_0(%arg0: i32, %arg1: memref<1xi32, #tpu.memory_space<smem>>) -> (i32, i32) {
    %c0_i32 = arith.constant 0 : i32
    %c0_i32_0 = arith.constant 0 : i32
    return %c0_i32, %arg0 : i32, i32
  }
  func.func @transform_1(%arg0: i32, %arg1: memref<1xi32, #tpu.memory_space<smem>>) -> (i32, i32) {
    %c0_i32 = arith.constant 0 : i32
    %c0_i32_0 = arith.constant 0 : i32
    return %c0_i32, %arg0 : i32, i32
  }
  func.func @transform_2(%arg0: i32, %arg1: memref<1xi32, #tpu.memory_space<smem>>) -> (i32, i32) {
    %c0_i32 = arith.constant 0 : i32
    %c0_i32_0 = arith.constant 0 : i32
    return %c0_i32, %arg0 : i32, i32
  }
}

</mosaic_0001>

<bundles_post_ra>
// kernel: tpu_custom_call.1
= control target key start
LH: loop header
LB: loop body
LE: loop exit
PB: predicated region body
PF: predicated region fallthrough
CT: control target
= control target key end

     0   :  { %9 = vsyncpa [#allocation5], 0  ;;  %s141_s0 = inlined_call_operand.<no memory space> [shape: s32[1], index: 0, kind: input, shape index: {}]   ;;  %s142_s1 = inlined_call_operand.hbm [shape: f32[2,256], index: 1, kind: input, shape index: {}]   ;;  %s143_s2 = inlined_call_operand.vmem [shape: f32[1,256], index: 2, kind: input, shape index: {}]   ;;  %s144_s3 = inlined_call_operand.hbm [shape: f32[2,256], index: 3, kind: output, shape index: {}]  }
   0x1   :  { %10 = vsyncpa [#allocation6], 0  ;;  %s16_s14 = sshll.u32 %s142_s1, 4  ;;  %s110_s15 = smov [#allocation4]   ;;  %s17_s14 = int_to_ptr.hbm [resolvable:$true] %s16_s14 }
   0x2   :  { %s18_s16 = sshll.u32 %s110_s15, 4  ;;  %s19_s16 = int_to_ptr.vmem [resolvable:$true] %s18_s16 }
   0x3   :  { %21 = dma.hbm_to_vmem [thread:$0]  %s17_s14, 64, %s19_s16, [#allocation5]  }
   0x4   :  { %106 = dma.done.wait [#allocation5], 64  }
   0x5   :  { %107 = vsyncadd [#allocation5], 4294967232  ;;  %v29_v0 = vld [vmem:[%s143_s2] sm:$0x3]  ;;  %vm34_vm0 = vcmask 1041408   ;;  %s111_s18 = smov [#allocation7]  }
   0x6   :  { %v31_v1 = vperm.slane %v29_v0, 0  ;;  %v32_v2 = vperm.slane %v29_v0, 1  ;;  %v28_v3 = vld [vmem:[#allocation4] sm:$0xf]  ;;  %s44_s19 = sshll.u32 %s111_s18, 4  ;;  %s46_s21 = sshll.u32 %s144_s3, 4  ;;  %s45_s19 = int_to_ptr.vmem [resolvable:$true] %s44_s19  ;;  %s47_s21 = int_to_ptr.hbm [resolvable:$true] %s46_s21 }
   0x8   :  { %v33_v4 = vrot.slane %v32_v2, 6 }
   0xa   :  { %v35_v5 = vsel %vm34_vm0, %v31_v1, %v33_v4 }
   0xb   :  { %v37_v6 = vadd.f32 %v35_v5, %v28_v3 }
   0xd   :  { %38 = vst [vmem:[#allocation7] sm:$0xf] %v37_v6 }
   0xe   :  { %49 = dma.vmem_to_hbm [thread:$0]  %s45_s19, 64, %s47_s21, [#allocation6]  }
   0xf   :  { %108 = dma.done.wait [#allocation6], 64  }
  0x10   :  { %109 = vsyncadd [#allocation6], 4294967232 }
  0x11   :  { %54 = vsyncpa [#allocation5], 1 }
  0x12   :  { %55 = vsyncpa [#allocation6], 1 }

</bundles_post_ra>
